<compile_context>
chip_gen: v6e
topology: v6e:2x2x1
jax: 0.10.0
libtpu: 0.0.40
codegen_flags: <defaults>
</compile_context>

<pallas_src>
import functools

import jax
import jax.numpy as jnp
from jax import lax
from jax.experimental import pallas as pl
from jax.experimental.pallas import tpu as pltpu

HEAD_WIDTH = 128  # lane-dense packed head width: [action probs | value | zeros]


def _elu(x):
    # ELU(alpha=1.0, PyTorch default). exp(x)-1 rather than expm1: expm1 has no
    # guaranteed Mosaic lowering; extra rounding is <=1 f32 ulp near 0, far
    # below the comparison tolerance.
    return jnp.where(x > 0, x, jnp.exp(x) - 1.0)


def _mf_actor_critic_kernel(x_ref, w1_ref, b1_ref, w2_ref, b2_ref,
                            wh_ref, bh_ref, out_ref, *, nr_actions):
    # MXU operands in bf16, accumulation + pointwise math in f32.
    x = x_ref[...].astype(jnp.bfloat16)

    # fc_net layer 1: Linear + ELU
    h1 = jnp.dot(x, w1_ref[...], preferred_element_type=jnp.float32) + b1_ref[...]
    h1 = _elu(h1)

    # fc_net layer 2: Linear + ELU
    h2 = jnp.dot(h1.astype(jnp.bfloat16), w2_ref[...],
                 preferred_element_type=jnp.float32) + b2_ref[...]
    h2 = _elu(h2)

    # Fused heads: one (TM, 128) matmul. lane < A -> action logits, lane == A -> value.
    logits = jnp.dot(h2.astype(jnp.bfloat16), wh_ref[...],
                     preferred_element_type=jnp.float32) + bh_ref[...]

    lane = lax.broadcasted_iota(jnp.int32, logits.shape, 1)
    is_action = lane < nr_actions

    # softmax(dim=-1) over the action lanes only.
    m = jnp.max(jnp.where(is_action, logits, -jnp.inf), axis=-1, keepdims=True)
    e = jnp.where(is_action, jnp.exp(logits - m), 0.0)
    inv = pl.reciprocal(jnp.sum(e, axis=-1, keepdims=True), approx=True)

    # Single lane-dense store: probs in lanes [0, A), value at lane A, zeros after.
    out_ref[...] = jnp.where(is_action, e * inv,
                             jnp.where(lane == nr_actions, logits, 0.0))


def pack_params(params):
    """f32 (in,out)-layout params -> packed kernel params (bf16 weights, fused heads)."""
    w1, b1, w2, b2, wa, ba, wv, bv = params
    H = w1.shape[1]
    A = wa.shape[1]
    assert A + 1 <= HEAD_WIDTH
    wh = jnp.zeros((H, HEAD_WIDTH), jnp.float32)
    wh = wh.at[:, :A].set(wa).at[:, A:A + 1].set(wv)
    bh = jnp.zeros((1, HEAD_WIDTH), jnp.float32)
    bh = bh.at[:, :A].set(ba).at[:, A:A + 1].set(bv)
    return (w1.astype(jnp.bfloat16), b1,
            w2.astype(jnp.bfloat16), b2,
            wh.astype(jnp.bfloat16), bh)


def mf_actor_critic_forward(x, packed_params, nr_actions, *, tm=256):
    """x: (B, C, H, W) float32. Returns (action_probs (B, A), value (B, 1))."""
    w1, b1, w2, b2, wh, bh = packed_params
    B = x.shape[0]
    F_in = w1.shape[0]
    H = w1.shape[1]

    x_flat = x.reshape(B, -1).astype(jnp.float32)  # matches x.view(batch_size, -1)

    # Batch tiling: one full-array block for small B; otherwise TM-row tiles
    # (zero-padded batch) pipelined over a "parallel" grid axis.
    if B <= tm:
        TM, Bp = B, B
    else:
        TM = tm  # 256 fills the v6e/v7x MXU; multiple of 128 so v5e is also happy.
        Bp = pl.cdiv(B, TM) * TM
        x_flat = jnp.pad(x_flat, ((0, Bp - B), (0, 0)))
    grid = (Bp // TM,)

    row = lambda i: (i, 0)
    const = lambda i: (0, 0)  # weights stay VMEM-resident across batch tiles

    out = pl.pallas_call(
        functools.partial(_mf_actor_critic_kernel, nr_actions=nr_actions),
        out_shape=jax.ShapeDtypeStruct((Bp, HEAD_WIDTH), jnp.float32),
        grid=grid,
        in_specs=[
            pl.BlockSpec((TM, F_in), row),          # x tile
            pl.BlockSpec((F_in, H), const),         # w1 (bf16)
            pl.BlockSpec((1, H), const),            # b1
            pl.BlockSpec((H, H), const),            # w2 (bf16)
            pl.BlockSpec((1, H), const),            # b2
            pl.BlockSpec((H, HEAD_WIDTH), const),   # fused+padded head weight (bf16)
            pl.BlockSpec((1, HEAD_WIDTH), const),   # fused+padded head bias
        ],
        out_specs=pl.BlockSpec((TM, HEAD_WIDTH), row),
        compiler_params=pltpu.CompilerParams(
            dimension_semantics=("parallel",)),
    )(x_flat, w1, b1, w2, b2, wh, bh)

    probs = out[:B, :nr_actions]
    value = out[:B, nr_actions:nr_actions + 1]
    return probs, value


def init_params(key, nr_input_features, nr_hidden_units, nr_actions):
    """Deterministic init mimicking PyTorch Linear default (U(-1/sqrt(fan_in), +))."""
    ks = jax.random.split(key, 8)

    def lin(kw, kb, fan_in, fan_out):
        bound = 1.0 / jnp.sqrt(jnp.float32(fan_in))
        w = jax.random.uniform(kw, (fan_in, fan_out), jnp.float32, -bound, bound)
        # biases kept 2D (1, fan_out) so they live cleanly in VMEM and broadcast
        b = jax.random.uniform(kb, (1, fan_out), jnp.float32, -bound, bound)
        return w, b

    w1, b1 = lin(ks[0], ks[1], nr_input_features, nr_hidden_units)
    w2, b2 = lin(ks[2], ks[3], nr_hidden_units, nr_hidden_units)
    wa, ba = lin(ks[4], ks[5], nr_hidden_units, nr_actions)
    wv, bv = lin(ks[6], ks[7], nr_hidden_units, 1)
    return (w1, b1, w2, b2, wa, ba, wv, bv)


def reference_forward(x, params):
    """Pure-JAX f32 reference matching the PyTorch module semantics."""
    w1, b1, w2, b2, wa, ba, wv, bv = params
    h = x.reshape(x.shape[0], -1)
    h = jax.nn.elu(h @ w1 + b1)
    h = jax.nn.elu(h @ w2 + b2)
    probs = jax.nn.softmax(h @ wa + ba, axis=-1)
    value = h @ wv + bv
    return probs, value


if __name__ == "__main__":
    key = jax.random.PRNGKey(0)
    k_x, k_p = jax.random.split(key)

    # Small shapes consistent with the module: input_shape=(4, 16, 16),
    # batch=2, nr_hidden_units=32, nr_actions=8.
    B, C, Hs, Ws = 2, 4, 16, 16
    nr_hidden_units = 32
    nr_actions = 8
    nr_input_features = C * Hs * Ws

    x = jax.random.normal(k_x, (B, C, Hs, Ws), dtype=jnp.float32)
    params = init_params(k_p, nr_input_features, nr_hidden_units, nr_actions)
    packed = pack_params(params)

    probs, value = mf_actor_critic_forward(x, packed, nr_actions)
    jax.block_until_ready((probs, value))

    # sanity check against pure-JAX f32 reference; tolerance loosened because the
    # kernel uses bf16 matmul weights (f32 accumulation) + approx softmax reciprocal.
    ref_probs, ref_value = reference_forward(x, params)
    assert probs.shape == (B, nr_actions)
    assert value.shape == (B, 1)
    assert jnp.allclose(probs, ref_probs, atol=2e-2, rtol=2e-2)
    assert jnp.allclose(value, ref_value, atol=2e-2, rtol=2e-2)
    assert bool(jnp.all(jnp.abs(jnp.sum(probs, axis=-1) - 1.0) < 1e-2))

    print("KERNEL_OK")
</pallas_src>

<mosaic_0001>
module attributes {stable_mosaic.version = 11 : i64} {
  func.func @_mf_actor_critic_kernel(%arg0: i32, %arg1: memref<2x1024xf32, #tpu.memory_space<vmem>>, %arg2: memref<1024x32xbf16, #tpu.memory_space<vmem>>, %arg3: memref<1x32xf32, #tpu.memory_space<vmem>>, %arg4: memref<32x32xbf16, #tpu.memory_space<vmem>>, %arg5: memref<1x32xf32, #tpu.memory_space<vmem>>, %arg6: memref<32x128xbf16, #tpu.memory_space<vmem>>, %arg7: memref<1x128xf32, #tpu.memory_space<vmem>>, %arg8: memref<2x128xf32, #tpu.memory_space<vmem>>) attributes {dimension_semantics = [#tpu.dimension_semantics<parallel>], iteration_bounds = array<i64: 1>, scalar_prefetch = 0 : i64, scratch_operands = 0 : i64, tpu.core_type = #tpu.core_type<tc>, window_params = [{transform_indices = @transform_0, window_bounds = array<i64: 2, 1024>}, {pipeline_mode = #tpu.pipeline_mode<synchronous>, transform_indices = @transform_1, window_bounds = array<i64: 1024, 32>}, {pipeline_mode = #tpu.pipeline_mode<synchronous>, transform_indices = @transform_2, window_bounds = array<i64: 1, 32>}, {pipeline_mode = #tpu.pipeline_mode<synchronous>, transform_indices = @transform_3, window_bounds = array<i64: 32, 32>}, {pipeline_mode = #tpu.pipeline_mode<synchronous>, transform_indices = @transform_4, window_bounds = array<i64: 1, 32>}, {pipeline_mode = #tpu.pipeline_mode<synchronous>, transform_indices = @transform_5, window_bounds = array<i64: 32, 128>}, {pipeline_mode = #tpu.pipeline_mode<synchronous>, transform_indices = @transform_6, window_bounds = array<i64: 1, 128>}, {transform_indices = @transform_7, window_bounds = array<i64: 2, 128>}]} {
    %c0 = arith.constant 0 : index
    %c0_0 = arith.constant 0 : index
    %0 = vector.load %arg1[%c0, %c0_0] : memref<2x1024xf32, #tpu.memory_space<vmem>>, vector<2x1024xf32>
    %1 = arith.truncf %0 : vector<2x1024xf32> to vector<2x1024xbf16>
    %c0_1 = arith.constant 0 : index
    %c0_2 = arith.constant 0 : index
    %2 = vector.load %arg2[%c0_1, %c0_2] : memref<1024x32xbf16, #tpu.memory_space<vmem>>, vector<1024x32xbf16>
    %cst = arith.constant dense<0.000000e+00> : vector<2x32xf32>
    %3 = tpu.matmul %1, %2, %cst {dimension_numbers = #tpu.dot_dimension_numbers<[1], [0], [0], [1], [0, 0, 1, 1], [], []>} : vector<2x1024xbf16>, vector<1024x32xbf16>, vector<2x32xf32> -> vector<2x32xf32>
    %c0_3 = arith.constant 0 : index
    %c0_4 = arith.constant 0 : index
    %4 = vector.load %arg3[%c0_3, %c0_4] : memref<1x32xf32, #tpu.memory_space<vmem>>, vector<1x32xf32>
    %5 = vector.broadcast %4 : vector<1x32xf32> to vector<2x32xf32>
    %6 = arith.addf %3, %5 : vector<2x32xf32>
    %cst_5 = arith.constant 0.000000e+00 : f32
    %7 = vector.broadcast %cst_5 : f32 to vector<2x32xf32>
    %8 = arith.cmpf ogt, %6, %7 : vector<2x32xf32>
    %9 = math.exp %6 : vector<2x32xf32>
    %cst_6 = arith.constant 1.000000e+00 : f32
    %10 = vector.broadcast %cst_6 : f32 to vector<2x32xf32>
    %11 = arith.subf %9, %10 : vector<2x32xf32>
    %12 = arith.select %8, %6, %11 : vector<2x32xi1>, vector<2x32xf32>
    %13 = arith.truncf %12 : vector<2x32xf32> to vector<2x32xbf16>
    %c0_7 = arith.constant 0 : index
    %c0_8 = arith.constant 0 : index
    %14 = vector.load %arg4[%c0_7, %c0_8] : memref<32x32xbf16, #tpu.memory_space<vmem>>, vector<32x32xbf16>
    %cst_9 = arith.constant dense<0.000000e+00> : vector<2x32xf32>
    %15 = tpu.matmul %13, %14, %cst_9 {dimension_numbers = #tpu.dot_dimension_numbers<[1], [0], [0], [1], [0, 0, 1, 1], [], []>} : vector<2x32xbf16>, vector<32x32xbf16>, vector<2x32xf32> -> vector<2x32xf32>
    %c0_10 = arith.constant 0 : index
    %c0_11 = arith.constant 0 : index
    %16 = vector.load %arg5[%c0_10, %c0_11] : memref<1x32xf32, #tpu.memory_space<vmem>>, vector<1x32xf32>
    %17 = vector.broadcast %16 : vector<1x32xf32> to vector<2x32xf32>
    %18 = arith.addf %15, %17 : vector<2x32xf32>
    %cst_12 = arith.constant 0.000000e+00 : f32
    %19 = vector.broadcast %cst_12 : f32 to vector<2x32xf32>
    %20 = arith.cmpf ogt, %18, %19 : vector<2x32xf32>
    %21 = math.exp %18 : vector<2x32xf32>
    %cst_13 = arith.constant 1.000000e+00 : f32
    %22 = vector.broadcast %cst_13 : f32 to vector<2x32xf32>
    %23 = arith.subf %21, %22 : vector<2x32xf32>
    %24 = arith.select %20, %18, %23 : vector<2x32xi1>, vector<2x32xf32>
    %25 = arith.truncf %24 : vector<2x32xf32> to vector<2x32xbf16>
    %c0_14 = arith.constant 0 : index
    %c0_15 = arith.constant 0 : index
    %26 = vector.load %arg6[%c0_14, %c0_15] : memref<32x128xbf16, #tpu.memory_space<vmem>>, vector<32x128xbf16>
    %cst_16 = arith.constant dense<0.000000e+00> : vector<2x128xf32>
    %27 = tpu.matmul %25, %26, %cst_16 {dimension_numbers = #tpu.dot_dimension_numbers<[1], [0], [0], [1], [0, 0, 1, 1], [], []>} : vector<2x32xbf16>, vector<32x128xbf16>, vector<2x128xf32> -> vector<2x128xf32>
    %c0_17 = arith.constant 0 : index
    %c0_18 = arith.constant 0 : index
    %28 = vector.load %arg7[%c0_17, %c0_18] : memref<1x128xf32, #tpu.memory_space<vmem>>, vector<1x128xf32>
    %29 = vector.broadcast %28 : vector<1x128xf32> to vector<2x128xf32>
    %30 = arith.addf %27, %29 : vector<2x128xf32>
    %31 = tpu.iota {dimensions = array<i32: 1>} : vector<2x128xi32>
    %c8_i32 = arith.constant 8 : i32
    %32 = vector.broadcast %c8_i32 : i32 to vector<2x128xi32>
    %33 = arith.cmpi slt, %31, %32 : vector<2x128xi32>
    %cst_19 = arith.constant 0xFF800000 : f32
    %34 = vector.broadcast %cst_19 : f32 to vector<2x128xf32>
    %35 = arith.select %33, %30, %34 : vector<2x128xi1>, vector<2x128xf32>
    %cst_20 = arith.constant dense<0xFF800000> : vector<2xf32>
    %36 = vector.multi_reduction <maximumf>, %35, %cst_20 [1] : vector<2x128xf32> to vector<2xf32>
    %37 = vector.shape_cast %36 : vector<2xf32> to vector<2x1xf32>
    %38 = vector.broadcast %37 : vector<2x1xf32> to vector<2x128xf32>
    %39 = arith.subf %30, %38 : vector<2x128xf32>
    %40 = math.exp %39 : vector<2x128xf32>
    %cst_21 = arith.constant 0.000000e+00 : f32
    %41 = vector.broadcast %cst_21 : f32 to vector<2x128xf32>
    %42 = arith.select %33, %40, %41 : vector<2x128xi1>, vector<2x128xf32>
    %cst_22 = arith.constant dense<0.000000e+00> : vector<2xf32>
    %43 = vector.multi_reduction <add>, %42, %cst_22 [1] : vector<2x128xf32> to vector<2xf32>
    %44 = vector.shape_cast %43 : vector<2xf32> to vector<2x1xf32>
    %45 = tpu.reciprocal %44 {approx = true} : vector<2x1xf32> -> vector<2x1xf32>
    %46 = vector.broadcast %45 : vector<2x1xf32> to vector<2x128xf32>
    %47 = arith.mulf %42, %46 : vector<2x128xf32>
    %c8_i32_23 = arith.constant 8 : i32
    %48 = vector.broadcast %c8_i32_23 : i32 to vector<2x128xi32>
    %49 = arith.cmpi eq, %31, %48 : vector<2x128xi32>
    %cst_24 = arith.constant 0.000000e+00 : f32
    %50 = vector.broadcast %cst_24 : f32 to vector<2x128xf32>
    %51 = arith.select %49, %30, %50 : vector<2x128xi1>, vector<2x128xf32>
    %52 = arith.select %33, %47, %51 : vector<2x128xi1>, vector<2x128xf32>
    %c0_25 = arith.constant 0 : index
    %c0_26 = arith.constant 0 : index
    %53 = vector.load %arg8[%c0_25, %c0_26] : memref<2x128xf32, #tpu.memory_space<vmem>>, vector<2x128xf32>
    tpu.vector_store %arg8[%c0_25, %c0_26], %52 {strides = array<i32>} : memref<2x128xf32, #tpu.memory_space<vmem>>, vector<2x128xf32>,
    return
  }
  func.func @transform_0(%arg0: i32) -> (i32, i32) {
    %c0_i32 = arith.constant 0 : i32
    %c0_i32_0 = arith.constant 0 : i32
    return %arg0, %c0_i32 : i32, i32
  }
  func.func @transform_1(%arg0: i32) -> (i32, i32) {
    %c0_i32 = arith.constant 0 : i32
    %c0_i32_0 = arith.constant 0 : i32
    %c0_i32_1 = arith.constant 0 : i32
    return %c0_i32, %c0_i32_0 : i32, i32
  }
  func.func @transform_2(%arg0: i32) -> (i32, i32) {
    %c0_i32 = arith.constant 0 : i32
    %c0_i32_0 = arith.constant 0 : i32
    %c0_i32_1 = arith.constant 0 : i32
    return %c0_i32, %c0_i32_0 : i32, i32
  }
  func.func @transform_3(%arg0: i32) -> (i32, i32) {
    %c0_i32 = arith.constant 0 : i32
    %c0_i32_0 = arith.constant 0 : i32
    %c0_i32_1 = arith.constant 0 : i32
    return %c0_i32, %c0_i32_0 : i32, i32
  }
  func.func @transform_4(%arg0: i32) -> (i32, i32) {
    %c0_i32 = arith.constant 0 : i32
    %c0_i32_0 = arith.constant 0 : i32
    %c0_i32_1 = arith.constant 0 : i32
    return %c0_i32, %c0_i32_0 : i32, i32
  }
  func.func @transform_5(%arg0: i32) -> (i32, i32) {
    %c0_i32 = arith.constant 0 : i32
    %c0_i32_0 = arith.constant 0 : i32
    %c0_i32_1 = arith.constant 0 : i32
    return %c0_i32, %c0_i32_0 : i32, i32
  }
  func.func @transform_6(%arg0: i32) -> (i32, i32) {
    %c0_i32 = arith.constant 0 : i32
    %c0_i32_0 = arith.constant 0 : i32
    %c0_i32_1 = arith.constant 0 : i32
    return %c0_i32, %c0_i32_0 : i32, i32
  }
  func.func @transform_7(%arg0: i32) -> (i32, i32) {
    %c0_i32 = arith.constant 0 : i32
    %c0_i32_0 = arith.constant 0 : i32
    return %arg0, %c0_i32 : i32, i32
  }
}

</mosaic_0001>

<bundles_post_ra>
// kernel: tpu_custom_call.1
= control target key start
LH: loop header
LB: loop body
LE: loop exit
PB: predicated region body
PF: predicated region fallthrough
CT: control target
= control target key end

     0   :  { %v36_v28 = vlaneseq  ;;  %v1230_v36 = vmov 1983009808   ;;  %s1509_s0 = inlined_call_operand.vmem [shape: f32[2,1024], index: 0, kind: input, shape index: {}]   ;;  %s1510_s1 = inlined_call_operand.vmem [shape: bf16[1024,32], index: 1, kind: input, shape index: {}]   ;;  %s1511_s2 = inlined_call_operand.vmem [shape: f32[1,32], index: 2, kind: input, shape index: {}]   ;;  %s1512_s3 = inlined_call_operand.vmem [shape: bf16[32,32], index: 3, kind: input, shape index: {}]   ;;  %s1513_s4 = inlined_call_operand.vmem [shape: f32[1,32], index: 4, kind: input, shape index: {}]   ;;  %s1514_s5 = inlined_call_operand.vmem [shape: bf16[32,128], index: 5, kind: input, shape index: {}]   ;;  %s1515_s6 = inlined_call_operand.vmem [shape: f32[1,128], index: 6, kind: input, shape index: {}]   ;;  %s1516_s7 = inlined_call_operand.hbm [shape: f32[2,128], index: 7, kind: output, shape index: {}]  }
   0x1   :  { %v1130_v0 = vld [vmem:[%s1510_s1 + $0x78] sm:$0xff]   ;;  %v1134_v4 = vld [vmem:[%s1510_s1 + $0x70] sm:$0xff]   ;;  %v1138_v8 = vld [vmem:[%s1510_s1 + $0x68] sm:$0xff]   ;;  %v34_v37 = vunpack.c.l.s4 %v1230_v36 }
   0x2   :  { %v1131_v1 = vld [vmem:[%s1510_s1 + $0xf8] sm:$0xff]   ;;  %1016 = vmatprep.subr.bf16.mxu0 %v1130_v0  ;;  %v1135_v5 = vld [vmem:[%s1510_s1 + $0xf0] sm:$0xff]   ;;  %v1139_v9 = vld [vmem:[%s1510_s1 + $0xe8] sm:$0xff]   ;;  %v37_v33 = vshrl.u32 %v36_v28, 7 }
   0x3   :  { %v1132_v2 = vld [vmem:[%s1510_s1 + $0x38] sm:$0xff]   ;;  %1038 = vmatprep.subr.bf16.mxu1 %v1131_v1  ;;  %v1136_v6 = vld [vmem:[%s1510_s1 + $0x30] sm:$0xff]   ;;  %v1140_v10 = vld [vmem:[%s1510_s1 + $0x28] sm:$0xff]   ;;  %v35_v39 = vunpack.c.0.s8 %v34_v37 }
   0x4   :  { %v1133_v3 = vld [vmem:[%s1510_s1 + $0xb8] sm:$0xff]   ;;  %1017 = vmatpush3.bf16.msra.mxu0 %v1132_v2  ;;  %v1137_v7 = vld [vmem:[%s1510_s1 + $0xb0] sm:$0xff]   ;;  %v1141_v11 = vld [vmem:[%s1510_s1 + $0xa8] sm:$0xff]  }
   0x5   :  { %1039 = vmatpush3.bf16.msra.mxu1 %v1133_v3  ;;  %1018 = vmatprep.subr.bf16.mxu0 %v1134_v4  ;;  %v1142_v12 = vld [vmem:[%s1510_s1 + $0x60] sm:$0xff]   ;;  %v1146_v16 = vld [vmem:[%s1510_s1 + $0x58] sm:$0xff]   ;;  %v1150_v20 = vld [vmem:[%s1510_s1 + $0x50] sm:$0xff]   ;;  %v1380_v41 = vsub.s32 %v35_v39, %v37_v33 }
   0x6   :  { %1040 = vmatprep.subr.bf16.mxu1 %v1135_v5  ;;  %v1143_v13 = vld [vmem:[%s1510_s1 + $0xe0] sm:$0xff]   ;;  %v1147_v17 = vld [vmem:[%s1510_s1 + $0xd8] sm:$0xff]   ;;  %v1151_v21 = vld [vmem:[%s1510_s1 + $0xd0] sm:$0xff]  }
   0x7   :  { %v1144_v14 = vld [vmem:[%s1510_s1 + $0x20] sm:$0xff]   ;;  %v1148_v18 = vld [vmem:[%s1510_s1 + $0x18] sm:$0xff]   ;;  %v1152_v22 = vld [vmem:[%s1510_s1 + $0x10] sm:$0xff]  }
   0x8   :  { %1019 = vmatpush3.bf16.msra.mxu0 %v1136_v6  ;;  %v1145_v15 = vld [vmem:[%s1510_s1 + $0xa0] sm:$0xff]   ;;  %v1149_v19 = vld [vmem:[%s1510_s1 + $0x98] sm:$0xff]   ;;  %v1153_v23 = vld [vmem:[%s1510_s1 + $0x90] sm:$0xff]  }
   0x9   :  { %1041 = vmatpush3.bf16.msra.mxu1 %v1137_v7  ;;  %1020 = vmatprep.subr.bf16.mxu0 %v1138_v8  ;;  %v1154_v24 = vld [vmem:[%s1510_s1 + $0x48] sm:$0xff]   ;;  %v1158_v29 = vld [vmem:[%s1510_s1 + $0x40] sm:$0xff]   ;;  %v1163_v35 = vld [vmem:[%s1510_s1 + $0x178] sm:$0xff]  }
   0xa   :  { %1042 = vmatprep.subr.bf16.mxu1 %v1139_v9  ;;  %v1155_v25 = vld [vmem:[%s1510_s1 + $0xc8] sm:$0xff]   ;;  %v1159_v30 = vld [vmem:[%s1510_s1 + $0xc0] sm:$0xff]   ;;  %v1164_v38 = vld [vmem:[%s1510_s1 + $0x1f8] sm:$0xff]  }
   0xb   :  { %v1156_v26 = vld [vmem:[%s1510_s1 + $0x8] sm:$0xff]   ;;  %v1160_v31 = vld [vmem:[%s1510_s1] sm:$0xff]   ;;  %v1165_v46 = vld [vmem:[%s1510_s1 + $0x138] sm:$0xff]  }
   0xc   :  { %1021 = vmatpush3.bf16.msra.mxu0 %v1140_v10  ;;  %v1157_v27 = vld [vmem:[%s1510_s1 + $0x88] sm:$0xff]   ;;  %v1161_v32 = vld [vmem:[%s1510_s1 + $0x80] sm:$0xff]   ;;  %v1166_v49 = vld [vmem:[%s1510_s1 + $0x1b8] sm:$0xff]  }
   0xd   :  { %1043 = vmatpush3.bf16.msra.mxu1 %v1141_v11  ;;  %1022 = vmatprep.subr.bf16.mxu0 %v1142_v12  ;;  %v28_v34 = vld [vmem:[%s1509_s0] sm:$0xff]  ;;  %v1167_v52 = vld [vmem:[%s1510_s1 + $0x170] sm:$0xff]   ;;  %v1171_v56 = vld [vmem:[%s1510_s1 + $0x168] sm:$0xff]  }
   0xe   :  { %1044 = vmatprep.subr.bf16.mxu1 %v1143_v13  ;;  %v32_v40 = vcombine.high %v28_v34, %v28_v34  ;;  %v39_v42 = vrot.slane %v28_v34, %v1380_v41  ;;  %v1168_v53 = vld [vmem:[%s1510_s1 + $0x1f0] sm:$0xff]   ;;  %v1172_v57 = vld [vmem:[%s1510_s1 + $0x1e8] sm:$0xff]   ;;  %v1175_v60 = vld [vmem:[%s1510_s1 + $0x160] sm:$0xff]  }
   0xf   :  { %v1169_v54 = vld [vmem:[%s1510_s1 + $0x130] sm:$0xff]   ;;  %v1173_v58 = vld [vmem:[%s1510_s1 + $0x128] sm:$0xff]   ;;  %v1176_v61 = vld [vmem:[%s1510_s1 + $0x1e0] sm:$0xff]  }
  0x10   :  { %1023 = vmatpush3.bf16.msra.mxu0 %v1144_v14  ;;  %v46_v43 = vrot.slane %v32_v40, %v1380_v41  ;;  %v47_v44 = vcombine.high %v39_v42, %v39_v42  ;;  %v74_v47 = vpack.c.bf16 %v39_v42, %v39_v42  ;;  %v1170_v55 = vld [vmem:[%s1510_s1 + $0x1b0] sm:$0xff]   ;;  %v1174_v59 = vld [vmem:[%s1510_s1 + $0x1a8] sm:$0xff]   ;;  %v1177_v62 = vld [vmem:[%s1510_s1 + $0x120] sm:$0xff]  }
  0x11   :  { %1045 = vmatpush3.bf16.msra.mxu1 %v1145_v15  ;;  %1024 = vmatprep.subr.bf16.mxu0 %v1146_v16  ;;  %v1178_v63 = vld [vmem:[%s1510_s1 + $0x1a0] sm:$0xff]   ;;  %v1179_v0 = vld [vmem:[%s1510_s1 + $0x158] sm:$0xff]   ;;  %v1183_v4 = vld [vmem:[%s1510_s1 + $0x150] sm:$0xff]  }
  0x12   :  { %1046 = vmatprep.subr.bf16.mxu1 %v1147_v17  ;;  %v48_v45 = vcombine.high %v46_v43, %v46_v43  ;;  %v76_v48 = vpack.c.bf16 %v46_v43, %v46_v43  ;;  %v75_v50 = vpack.c.bf16 %v47_v44, %v47_v44  ;;  %v1180_v1 = vld [vmem:[%s1510_s1 + $0x1d8] sm:$0xff]   ;;  %v1184_v5 = vld [vmem:[%s1510_s1 + $0x1d0] sm:$0xff]   ;;  %v1187_v8 = vld [vmem:[%s1510_s1 + $0x148] sm:$0xff]  }
  0x13   :  { %v1181_v2 = vld [vmem:[%s1510_s1 + $0x118] sm:$0xff]   ;;  %v1185_v6 = vld [vmem:[%s1510_s1 + $0x110] sm:$0xff]   ;;  %v1188_v9 = vld [vmem:[%s1510_s1 + $0x1c8] sm:$0xff]  }
  0x14   :  { %1025 = vmatpush3.bf16.msra.mxu0 %v1148_v18  ;;  %v77_v51 = vpack.c.bf16 %v48_v45, %v48_v45  ;;  %633 = vmatprep.mubr.bf16.mxu0 %v75_v50  ;;  %v1182_v3 = vld [vmem:[%s1510_s1 + $0x198] sm:$0xff]   ;;  %v1186_v7 = vld [vmem:[%s1510_s1 + $0x190] sm:$0xff]   ;;  %v29_v10 = vld [vmem:[%s1509_s0 + $0x8] sm:$0xff] }
  0x15   :  { %1047 = vmatpush3.bf16.msra.mxu1 %v1149_v19  ;;  %1026 = vmatprep.subr.bf16.mxu0 %v1150_v20  ;;  %v1189_v11 = vld [vmem:[%s1510_s1 + $0x108] sm:$0xff]   ;;  %v56_v12 = vrot.slane %v29_v10, %v1380_v41  ;;  %v49_v13 = vcombine.high %v29_v10, %v29_v10 }
  0x16   :  { %1048 = vmatprep.subr.bf16.mxu1 %v1151_v21  ;;  %673 = vmatprep.mubr.bf16.mxu1 %v77_v51  ;;  %v1190_v14 = vld [vmem:[%s1510_s1 + $0x188] sm:$0xff]  }
  0x17   :  { %v64_v15 = vcombine.high %v56_v12, %v56_v12  ;;  %v63_v16 = vrot.slane %v49_v13, %v1380_v41 }
  0x18   :  { %1027 = vmatpush3.bf16.msra.mxu0 %v1152_v22 }
  0x19   :  { %1049 = vmatpush3.bf16.msra.mxu1 %v1153_v23  ;;  %1028 = vmatprep.subr.bf16.mxu0 %v1154_v24 }
  0x1a   :  { %1050 = vmatprep.subr.bf16.mxu1 %v1155_v25 }
  0x1c   :  { %1029 = vmatpush3.bf16.msra.mxu0 %v1156_v26 }
  0x1d   :  { %1051 = vmatpush3.bf16.msra.mxu1 %v1157_v27  ;;  %1030 = vmatprep.subr.bf16.mxu0 %v1158_v29 }
  0x1e   :  { %1052 = vmatprep.subr.bf16.mxu1 %v1159_v30 }
  0x20   :  { %1031 = vmatpush3.bf16.msra.mxu0 %v1160_v31 }
  0x21   :  { %1053 = vmatpush3.bf16.msra.mxu1 %v1161_v32  ;;  %1060 = vmatprep.subr.bf16.mxu0 %v1163_v35 }
  0x22   :  { %1082 = vmatprep.subr.bf16.mxu1 %v1164_v38 }
  0x23   :  { %634 = vmatmul.mubr.bf16.vlgmr.msra.gmra.mxu0 %v74_v47 }
  0x24   :  { %674 = vmatmul.mubr.bf16.vlgmr.msra.gmra.mxu1 %v76_v48  ;;  %1061 = vmatpush3.bf16.msra.mxu0 %v1165_v46 }
  0x25   :  { %1083 = vmatpush3.bf16.msra.mxu1 %v1166_v49  ;;  %1062 = vmatprep.subr.bf16.mxu0 %v1167_v52 }
  0x26   :  { %1084 = vmatprep.subr.bf16.mxu1 %v1168_v53 }
  0x28   :  { %1063 = vmatpush3.bf16.msra.mxu0 %v1169_v54 }
  0x29   :  { %1085 = vmatpush3.bf16.msra.mxu1 %v1170_v55  ;;  %1064 = vmatprep.subr.bf16.mxu0 %v1171_v56 }
  0x2a   :  { %1086 = vmatprep.subr.bf16.mxu1 %v1172_v57 }
  0x2c   :  { %1065 = vmatpush3.bf16.msra.mxu0 %v1173_v58 }
  0x2d   :  { %1087 = vmatpush3.bf16.msra.mxu1 %v1174_v59  ;;  %1066 = vmatprep.subr.bf16.mxu0 %v1175_v60 }
  0x2e   :  { %1088 = vmatprep.subr.bf16.mxu1 %v1176_v61 }
  0x30   :  { %1067 = vmatpush3.bf16.msra.mxu0 %v1177_v62 }
  0x31   :  { %1089 = vmatpush3.bf16.msra.mxu1 %v1178_v63  ;;  %1068 = vmatprep.subr.bf16.mxu0 %v1179_v0 }
  0x32   :  { %1090 = vmatprep.subr.bf16.mxu1 %v1180_v1 }
  0x34   :  { %1069 = vmatpush3.bf16.msra.mxu0 %v1181_v2 }
  0x35   :  { %1091 = vmatpush3.bf16.msra.mxu1 %v1182_v3  ;;  %1070 = vmatprep.subr.bf16.mxu0 %v1183_v4 }
  0x36   :  { %1092 = vmatprep.subr.bf16.mxu1 %v1184_v5 }
  0x38   :  { %1071 = vmatpush3.bf16.msra.mxu0 %v1185_v6 }
  0x39   :  { %1093 = vmatpush3.bf16.msra.mxu1 %v1186_v7 }
  0x3a   :  { %12 = vsyncpa [#allocation3], 0  ;;  %1072 = vmatprep.subr.bf16.mxu0 %v1187_v8  ;;  %1094 = vmatprep.subr.bf16.mxu1 %v1188_v9  ;;  %v1191_v17 = vld [vmem:[%s1510_s1 + $0x140] sm:$0xff]   ;;  %v79_v19 = vpack.c.bf16 %v64_v15, %v64_v15  ;;  %v65_v20 = vcombine.high %v63_v16, %v63_v16  ;;  %v78_v24 = vpack.c.bf16 %v56_v12, %v56_v12  ;;  %v1196_v26 = vld [vmem:[%s1512_s3 + $0x8] sm:$0xff]   ;;  %v1231_v27 = vmov 0.0  }
  0x3b   :  { %v1192_v18 = vld [vmem:[%s1510_s1 + $0x1c0] sm:$0xff]   ;;  %v80_v25 = vpack.c.bf16 %v63_v16, %v63_v16  ;;  %vm1232_vm0 = vmmov 0   ;;  %vm790_vm2 = vcmask 261120   ;;  %v1198_v60 = vld [vmem:[%s1514_s5 + $0x8] sm:$0xff]   ;;  %v907_v9 = vand.u32 127, %v36_v28 }
  0x3c   :  { %1073 = vmatpush3.bf16.msra.mxu0 %v1189_v11  ;;  %v1193_v21 = vld [vmem:[%s1510_s1 + $0x100] sm:$0xff]   ;;  %v81_v23 = vpack.c.bf16 %v65_v20, %v65_v20  ;;  %713 = vmatprep.mubr.bf16.mxu0 %v79_v19  ;;  %vm910_vm5 = vcmask 1041408  }
  0x3d   :  { %1095 = vmatpush3.bf16.msra.mxu1 %v1190_v14  ;;  %v1194_v22 = vld [vmem:[%s1510_s1 + $0x180] sm:$0xff]   ;;  %1074 = vmatprep.subr.bf16.mxu0 %v1191_v17  ;;  %vm908_vm4 = vcmp.lt.s32.totalorder %v907_v9, 8  ;;  %vm923_vm6 = vcmp.eq.s32.totalorder %v907_v9, 8 }
  0x3e   :  { %1096 = vmatprep.subr.bf16.mxu1 %v1192_v18  ;;  %753 = vmatprep.mubr.bf16.mxu1 %v81_v23  ;;  %v1197_v29 = vld [vmem:[%s1512_s3] sm:$0xff]  }
  0x3f   :  { %v941_v39 = vld [vmem:[%s1511_s2] ss:$0 sm:$0xff] }
  0x40   :  { %1075 = vmatpush3.bf16.msra.mxu0 %v1193_v21  ;;  %v1199_v61 = vld [vmem:[%s1514_s5] sm:$0xff]  }
  0x41   :  { %1097 = vmatpush3.bf16.msra.mxu1 %v1194_v22  ;;  %1110 = vmatprep.subr.bf16.mxu0 %v1231_v27  ;;  %v1007_v62 = vld [vmem:[%s1513_s4] ss:$0 sm:$0xff]  ;;  %s1233_s4 = smov [#allocation2]  }
  0x42   :  { %1118 = vmatprep.subr.bf16.mxu1 %v1231_v27  ;;  %v1012_v10 = vld [vmem:[%s1515_s6] ss:$0 sm:$0xff]  ;;  %s933_s6 = sshll.u32 %s1233_s4, 4  ;;  %s934_s6 = int_to_ptr.vmem [resolvable:$true] %s933_s6 }
  0x43   :  { %714 = vmatmul.mubr.bf16.vlgmr.msra.gmra.mxu0 %v78_v24  ;;  %s1208_s27 = scalar_lea.vmem %s934_s6, 32  ;;  %p1213_p1 = scmp.lt.s32.totalorder %s934_s6, %s934_s6 }
  0x44   :  { %754 = vmatmul.mubr.bf16.vlgmr.msra.gmra.mxu1 %v80_v25  ;;  %1111 = vmatpush3.bf16.msra.mxu0 %v1196_v26  ;;  %p1209_p0 = scmp.ne.s32.totalorder %s934_s6, %s1208_s27  ;;  %p1214_p2 = scmp.lt.s32.totalorder %s1208_s27, %s1208_s27 }
  0x45   :  { %1112 = vmatprep.subr.bf16.mxu0 %v1231_v27  ;;  %1114 = vmatprep.mubr.msk.bf16.mxu0 %vm1232_vm0, %v1231_v27 }
  0x46   :  { %1122 = vmatprep.mubr.msk.bf16.mxu1 %vm1232_vm0, %v1231_v27  ;;  %1119 = vmatpush3.bf16.msra.mxu1 %v1198_v60  ;;  %p1215_p3 = por %p1214_p2, %p1213_p1 }
  0x47   :  { %1120 = vmatprep.subr.bf16.mxu1 %v1231_v27 }
  0x48   :  { %1113 = vmatpush3.bf16.msra.mxu0 %v1197_v29  ;;  %p1216_p4 = pnand %p1215_p3, %p1209_p0 }
  0x4a   :  { %1121 = vmatpush3.bf16.msra.mxu1 %v1199_v61 }
  0xe3   :  { %v1032_v30 = vpop.f32.mrf.mxu0 }
  0xe4   :  { %v1054_v31 = vpop.f32.mrf.mxu1 }
  0xe5   :  { %v1033_v32 = vpop.f32.mrf.mxu0 }
  0xe6   :  { %v1055_v33 = vpop.f32.mrf.mxu1  ;;  %v1034_v38 = vadd.f32 %v1033_v32, %v1032_v30 }
  0xe7   :  { %v1035_v34 = vpop.f32.mrf.mxu0  ;;  %v1056_v41 = vadd.f32 %v1055_v33, %v1054_v31 }
  0xe8   :  { %v1057_v35 = vpop.f32.mrf.mxu1  ;;  %v636_v40 = vadd.f32 %v1034_v38, %v941_v39 }
  0xe9   :  { %v1036_v36 = vpop.f32.mrf.mxu0 }
  0xea   :  { %v1058_v37 = vpop.f32.mrf.mxu1  ;;  %v676_v46 = vadd.f32 %v1056_v41, %v636_v40 }
 0x103   :  { %v1076_v42 = vpop.f32.mrf.mxu0 }
 0x104   :  { %v1098_v43 = vpop.f32.mrf.mxu1 }
 0x105   :  { %v1077_v44 = vpop.f32.mrf.mxu0 }
 0x106   :  { %v1099_v45 = vpop.f32.mrf.mxu1  ;;  %v1078_v47 = vadd.f32 %v1077_v44, %v1076_v42 }
 0x107   :  { %v1079_v48 = vpop.f32.mrf.mxu0  ;;  %v1100_v51 = vadd.f32 %v1099_v45, %v1098_v43 }
 0x108   :  { %v1101_v49 = vpop.f32.mrf.mxu1  ;;  %v716_v50 = vadd.f32 %v1078_v47, %v676_v46 }
 0x109   :  { %v1080_v52 = vpop.f32.mrf.mxu0 }
 0x10a   :  { %v1102_v53 = vpop.f32.mrf.mxu1  ;;  %v756_v54 = vadd.f32 %v1100_v51, %v716_v50 }
 0x10c   :  { %v762_v55 = vmul.f32 1.442695, %v756_v54  ;;  %vm761_vm1 = vcmp.gt.f32.partialorder %v756_v54, 0.0 }
 0x10e   :  { %1200 = vpow2.f32 %v762_v55 }
 0x11b   :  { %v1201_v56 = vpop.eup %1200 }
 0x11c   :  { %v1006_v57 = vadd.f32 -1.0, %v1201_v56 }
 0x11e   :  { %v765_v58 = vsel %vm761_vm1, %v756_v54, %v1006_v57 }
 0x11f   :  { %v766_v59 = vpack.c.bf16 %v765_v58, %v765_v58 }
 0x121   :  { %1115 = vmatmul.mubr.msk.bf16.vlgmr.msra.gmra.mxu0 %vm790_vm2, %v766_v59 }
 0x1e1   :  { %v828_v63 = vpop.f32.mrf.mxu0 }
 0x1e2   :  { %v829_v0 = vadd.f32 %v1007_v62, %v828_v63 }
 0x1e3   :  { %v1116_v1 = vpop.f32.mrf.mxu0 }
 0x1e4   :  { %v835_v2 = vmul.f32 1.442695, %v829_v0  ;;  %vm834_vm3 = vcmp.gt.f32.partialorder %v829_v0, 0.0 }
 0x1e5   :  { %v831_v3 = vpop.f32.mrf.mxu0 }
 0x1e6   :  { %1202 = vpow2.f32 %v835_v2 }
 0x1e7   :  { %v1117_v4 = vpop.f32.mrf.mxu0 }
 0x1f3   :  { %v1203_v5 = vpop.eup %1202 }
 0x1f4   :  { %v1011_v6 = vadd.f32 -1.0, %v1203_v5 }
 0x1f6   :  { %v838_v7 = vsel %vm834_vm3, %v829_v0, %v1011_v6 }
 0x1f7   :  { %v839_v8 = vpack.c.bf16 %v838_v7, %v838_v7 }
 0x1f9   :  { %1123 = vmatmul.mubr.msk.bf16.vlgmr.msra.gmra.mxu1 %vm790_vm2, %v839_v8 }
 0x2b9   :  { %v900_v11 = vpop.f32.mrf.mxu1 }
 0x2ba   :  { %v901_v12 = vadd.f32 %v1012_v10, %v900_v11 }
 0x2bb   :  { %v1124_v13 = vpop.f32.mrf.mxu1 }
 0x2bc   :  { %v909_v14 = vsel %vm908_vm4, %v901_v12, -inf  ;;  %v924_v26 = vsel %vm923_vm6, %v901_v12, 0.0 }
 0x2bd   :  { %v903_v15 = vpop.f32.mrf.mxu1  ;;  %v911_v16 = vsel %vm910_vm5, %v909_v14, -inf }
 0x2be   :  { %912 = vmax.xlane.f32.xlu0 %v911_v16 }
 0x2bf   :  { %v1125_v17 = vpop.f32.mrf.mxu1 }
 0x347   :  { %v913_v18 = vpop.xlane.xlu0 %912 }
 0x348   :  { %v914_v19 = vsub.f32 %v901_v12, %v913_v18 }
 0x34a   :  { %v915_v20 = vmul.f32 1.442695, %v914_v19 }
 0x34c   :  { %1204 = vpow2.f32 %v915_v20 }
 0x359   :  { %v1205_v28 = vpop.eup %1204 }
 0x35a   :  { %v917_v21 = vsel %vm908_vm4, %v1205_v28, 0.0 }
 0x35b   :  { %v918_v22 = vsel %vm910_vm5, %v917_v21, 0.0 }
 0x35c   :  { %919 = vadd.xlane.f32.xlu0 %v918_v22 }
 0x3e5   :  { %v920_v23 = vpop.xlane.xlu0 %919 }
 0x3e6   :  { %1206 = vrcp.f32 %v920_v23 }
 0x3f3   :  { %v1207_v24 = vpop.eup %1206 }
 0x3f4   :  { %v922_v25 = vmul.f32 %v1207_v24, %v917_v21 }
 0x3f6   :  { %v925_v27 = vsel %vm908_vm4, %v922_v25, %v924_v26 }
 0x3f7   :  { %926 = vst [vmem:[#allocation2] sm:$0x3] %v925_v27 }
 0x3f8   :  { %1219 = shalt.err (!%p1216_p4)
}
 0x3f9   :  { %936 = dma.vmem_to_hbm [thread:$0]  %s934_s6, 32, %s1516_s7, [#allocation3]  }
 0x3fa   :  { %1228 = dma.done.wait [#allocation3], 32  }
 0x3fb   :  { %1229 = vsyncadd [#allocation3], 4294967264 }
 0x3fc   :  { %940 = vsyncpa [#allocation3], 1 }

</bundles_post_ra>
